<compile_context>
chip_gen: v6e
topology: v6e:2x2x1
jax: 0.10.0
libtpu: 0.0.40
codegen_flags: <defaults>
</compile_context>

<pallas_src>
import jax
import jax.numpy as jnp
from jax.experimental import pallas as pl
from jax.experimental.pallas import tpu as pltpu


# -----------------------------------------------------------------------------
# Small helpers
# -----------------------------------------------------------------------------
def _vmem_limit_bytes():
    """Generation-aware scoped-VMEM limit (headroom below physical VMEM)."""
    try:
        cap = int(pltpu.get_tpu_info().vmem_capacity_bytes)
    except Exception:
        cap = 64 << 20  # conservative fallback (v7x physical size)
    # ~50 MiB on v7x (64 MiB phys), ~100 MiB on v5e/v6e (128 MiB phys).
    return max(32 << 20, min(int(cap * 0.78), cap - (12 << 20)))


def _swap01_3d(x):
    """(A, B, C) -> (B, A, C); lane (last) dim unchanged."""
    if hasattr(pltpu, "einshape"):
        return pltpu.einshape("abc->bac", x)
    return jnp.transpose(x, (1, 0, 2))


def _pick_tile(full, cap, step):
    """Largest multiple-of-`step` divisor of `full` that is <= cap (fallback: full dim)."""
    best = None
    t = step
    while t <= min(full, cap):
        if full % t == 0:
            best = t
        t += step
    return best if best is not None else full


# -----------------------------------------------------------------------------
# Phase 1: layer-0 input projection, K-tiled, transpose folded into the kernel.
#   out gates_x: (S, B, 4H) f32 (time-major for the recurrent kernel).
# -----------------------------------------------------------------------------
def _input_proj_kernel(x_ref, w_ref, b_ref, gx_ref, acc_ref):
    k = pl.program_id(1)

    @pl.when(k == 0)
    def _():
        acc_ref[...] = jnp.zeros_like(acc_ref)

    B, ts, tk = x_ref.shape
    a = x_ref[...].reshape(B * ts, tk).astype(w_ref.dtype)   # bf16 cast for the MXU
    acc_ref[...] += jnp.dot(a, w_ref[...], preferred_element_type=jnp.float32)

    @pl.when(k == pl.num_programs(1) - 1)
    def _():
        g = (acc_ref[...] + b_ref[...]).reshape(B, ts, gx_ref.shape[-1])
        gx_ref[...] = _swap01_3d(g)          # fold (B,S)->(S,B) into the kernel


def _input_projection(x, w_ih1_t, b1, *, vmem_limit):
    B, S, V = x.shape
    G = w_ih1_t.shape[1]                                       # 4H
    ts = _pick_tile(S, max(8, 256 // max(B, 1)), 8)            # ~256 MXU rows per tile
    tk = _pick_tile(V, 2048, 128)                              # bound VMEM for large vocab
    return pl.pallas_call(
        _input_proj_kernel,
        out_shape=jax.ShapeDtypeStruct((S, B, G), jnp.float32),
        grid_spec=pltpu.PrefetchScalarGridSpec(
            num_scalar_prefetch=0,
            grid=(S // ts, V // tk),
            in_specs=[
                pl.BlockSpec((B, ts, tk), lambda s, k: (0, s, k)),   # x (batch-major in HBM)
                pl.BlockSpec((tk, G), lambda s, k: (k, 0)),          # W_ih_l0^T (bf16)
                pl.BlockSpec((1, G), lambda s, k: (0, 0)),           # fused l0 bias (f32)
            ],
            out_specs=pl.BlockSpec((ts, B, G), lambda s, k: (s, 0, 0)),  # time-major gates_x
            scratch_shapes=[pltpu.VMEM((B * ts, G), jnp.float32)],
        ),
        compiler_params=pltpu.CompilerParams(
            dimension_semantics=("parallel", "arbitrary"),
            vmem_limit_bytes=vmem_limit),
    )(x, w_ih1_t, b1)
    # TODO(synk): if x is one-hot (autoregressive decode path), replace this matmul with a
    # row gather of wih1_t via scalar-prefetched indices — O(S*B*4H) instead of O(S*B*V*4H).


# -----------------------------------------------------------------------------
# Phase 2: recurrent kernel over time chunks, with the output Linear fused as a
# per-chunk epilogue.  Gate order matches PyTorch: [i, f, g, o].
# -----------------------------------------------------------------------------
def _lstm_fused_kernel(gx_ref, h0_ref, c0_ref,
                       whh1_ref, w2_ref, b2_ref, wout_ref, bout_ref,
                       logits_ref, hn_ref, cn_ref,
                       xin2_ref, h2buf_ref):
    tb = pl.program_id(0)
    T = gx_ref.shape[0]            # time steps in this chunk (static)
    H = hn_ref.shape[-1]
    cdt = whh1_ref.dtype           # bf16 compute dtype for MXU inputs

    @pl.when(tb == 0)
    def _():
        hn_ref[...] = h0_ref[...]
        cn_ref[...] = c0_ref[...]
        xin2_ref[:, :H] = h0_ref[0].astype(cdt)
        xin2_ref[:, H:] = h0_ref[1].astype(cdt)

    whh1 = whh1_ref[...]           # (H, 4H)  bf16
    w2 = w2_ref[...]               # (2H, 4H) bf16  (stacked [W_ih_l1; W_hh_l1]^T)
    b2 = b2_ref[...]               # (1, 4H)  f32

    def sigmoid(v):                # one EUP push (tanh) instead of exp + reciprocal
        return 0.5 * jnp.tanh(0.5 * v) + 0.5

    def gates_to_hc(g, c_prev):    # g: (B, 4H) f32, lane-aligned H slices
        i_g = sigmoid(g[:, 0 * H:1 * H])
        f_g = sigmoid(g[:, 1 * H:2 * H])
        g_g = jnp.tanh(g[:, 2 * H:3 * H])
        o_g = sigmoid(g[:, 3 * H:4 * H])
        c_new = f_g * c_prev + i_g * g_g
        return o_g * jnp.tanh(c_new), c_new

    def body(tt, carry):
        h1, c1, h2, c2 = carry
        # Layer 1: input part + bias precomputed in gates_x; xin2[:, :H] holds bf16 h1_prev.
        g1 = gx_ref[tt] + jnp.dot(xin2_ref[:, :H], whh1,
                                  preferred_element_type=jnp.float32)
        h1, c1 = gates_to_hc(g1, c1)
        xin2_ref[:, :H] = h1.astype(cdt)
        # Layer 2: one fused matmul over the persistent [h1_new, h2_prev] bf16 buffer
        # (no per-step concatenate / relayout on the serialized critical path).
        g2 = jnp.dot(xin2_ref[...], w2, preferred_element_type=jnp.float32) + b2
        h2, c2 = gates_to_hc(g2, c2)
        xin2_ref[:, H:] = h2.astype(cdt)
        h2buf_ref[tt] = h2
        return (h1, c1, h2, c2)

    carry0 = (hn_ref[0], cn_ref[0], hn_ref[1], cn_ref[1])
    h1, c1, h2, c2 = jax.lax.fori_loop(0, T, body, carry0, unroll=True)

    # Resident output blocks carry the state to the next chunk; after the final chunk
    # they are the returned (h_n, c_n).
    hn_ref[0] = h1
    hn_ref[1] = h2
    cn_ref[0] = c1
    cn_ref[1] = c2

    # Fused output projection epilogue: one (T*B, H) @ (H, V) matmul per chunk, stored
    # directly in (B, t_blk, V) layout -> no h2_seq HBM round trip, no output transpose.
    # TODO(synk): tile the V dim of this epilogue (inner loop / emit_pipeline) for very
    # large vocabularies.
    B = h2buf_ref.shape[1]
    V = logits_ref.shape[-1]
    h2c = h2buf_ref[...].reshape(T * B, H).astype(wout_ref.dtype)
    lg = jnp.dot(h2c, wout_ref[...], preferred_element_type=jnp.float32) + bout_ref[...]
    logits_ref[...] = _swap01_3d(lg.reshape(T, B, V))


def text_generation_forward(x, h_0, c_0, params, *, t_blk=None):
    """Pallas equivalent of TextGenerationModel.forward (num_layers fixed to 2).

    x: (B, S, V) f32;  h_0, c_0: (2, B, H) f32.
    returns (logits (B, S, V) f32, (h_n (2, B, H), c_n (2, B, H)))
    """
    B, S, V = x.shape
    H = params["whh1_t"].shape[0]
    L = 2
    assert H % 128 == 0, "hidden size must be lane-aligned (multiple of 128)"

    vmem_limit = _vmem_limit_bytes()

    # Phase 1: hoisted, K-tiled layer-0 input projection -> time-major gates_x (S, B, 4H).
    gates_x = _input_projection(x, params["wih1_t"], params["b1"], vmem_limit=vmem_limit)

    # Phase 2: chunked recurrence (sequential => "arbitrary") + fused output head.
    if t_blk is None:
        t_blk = _pick_tile(S, 32, 8)       # 16-32 steps/chunk when S permits
    assert S % t_blk == 0, (S, t_blk)

    # TODO(synk): on v7x add pipeline_mode=pl.Buffered(1) to the constant-index weight
    # BlockSpecs below (halves their resident VMEM once H>=1024), and when B is large add a
    # leading "parallel" batch-tile grid axis so the second TensorCore runs half the batch.
    logits, h_n, c_n = pl.pallas_call(
        _lstm_fused_kernel,
        out_shape=[
            jax.ShapeDtypeStruct((B, S, V), jnp.float32),
            jax.ShapeDtypeStruct((L, B, H), jnp.float32),
            jax.ShapeDtypeStruct((L, B, H), jnp.float32),
        ],
        grid_spec=pltpu.PrefetchScalarGridSpec(
            num_scalar_prefetch=0,
            grid=(S // t_blk,),
            in_specs=[
                pl.BlockSpec((t_blk, B, 4 * H), lambda t: (t, 0, 0)),   # gates_x chunk
                pl.BlockSpec((L, B, H), lambda t: (0, 0, 0)),           # h_0
                pl.BlockSpec((L, B, H), lambda t: (0, 0, 0)),           # c_0
                pl.BlockSpec((H, 4 * H), lambda t: (0, 0)),             # W_hh_l0^T
                pl.BlockSpec((2 * H, 4 * H), lambda t: (0, 0)),         # [W_ih_l1; W_hh_l1]^T
                pl.BlockSpec((1, 4 * H), lambda t: (0, 0)),             # layer-1 fused bias
                pl.BlockSpec((H, V), lambda t: (0, 0)),                 # W_out^T
                pl.BlockSpec((1, V), lambda t: (0, 0)),                 # b_out
            ],
            out_specs=[
                pl.BlockSpec((B, t_blk, V), lambda t: (0, t, 0)),       # logits (batch-major)
                pl.BlockSpec((L, B, H), lambda t: (0, 0, 0)),           # h_n (resident state)
                pl.BlockSpec((L, B, H), lambda t: (0, 0, 0)),           # c_n (resident state)
            ],
            scratch_shapes=[
                pltpu.VMEM((B, 2 * H), jnp.bfloat16),                   # persistent [h1|h2] bf16
                pltpu.VMEM((t_blk, B, H), jnp.float32),                 # per-chunk h2 buffer
            ],
        ),
        compiler_params=pltpu.CompilerParams(
            dimension_semantics=("arbitrary",),
            vmem_limit_bytes=vmem_limit),
    )(gates_x, h_0, c_0,
      params["whh1_t"], params["w2_t"], params["b2"],
      params["wout_t"], params["bout"])

    return logits, (h_n, c_n)
    # TODO(synk): forward_autoregressive (greedy argmax -> one-hot decode loop) is host-side
    # control flow around the same recurrence; not implemented as a kernel.


# -----------------------------------------------------------------------------
# Pure-JAX reference (same precision recipe: bf16 matmul inputs, f32 accumulation
# and nonlinearities) for the correctness check.
# -----------------------------------------------------------------------------
def ref_forward(x, h_0, c_0, params):
    H = params["whh1_t"].shape[0]

    def mm(a, w):
        return jnp.dot(a.astype(w.dtype), w, preferred_element_type=jnp.float32)

    def gates_to_hc(g, c_prev):
        i_g = jax.nn.sigmoid(g[:, 0 * H:1 * H])
        f_g = jax.nn.sigmoid(g[:, 1 * H:2 * H])
        g_g = jnp.tanh(g[:, 2 * H:3 * H])
        o_g = jax.nn.sigmoid(g[:, 3 * H:4 * H])
        c_new = f_g * c_prev + i_g * g_g
        return o_g * jnp.tanh(c_new), c_new

    def step(carry, x_t):
        h1, c1, h2, c2 = carry
        g1 = mm(x_t, params["wih1_t"]) + params["b1"] + mm(h1, params["whh1_t"])
        h1, c1 = gates_to_hc(g1, c1)
        g2 = mm(jnp.concatenate([h1, h2], axis=-1), params["w2_t"]) + params["b2"]
        h2, c2 = gates_to_hc(g2, c2)
        logits_t = mm(h2, params["wout_t"]) + params["bout"]
        return (h1, c1, h2, c2), logits_t

    x_tm = jnp.transpose(x, (1, 0, 2))
    (h1, c1, h2, c2), out_tm = jax.lax.scan(
        step, (h_0[0], c_0[0], h_0[1], c_0[1]), x_tm)
    logits = jnp.transpose(out_tm, (1, 0, 2))
    return logits, (jnp.stack([h1, h2], axis=0), jnp.stack([c1, c2], axis=0))


# -----------------------------------------------------------------------------
# Deterministic parameter init (PyTorch-style U(-1/sqrt(H), 1/sqrt(H))),
# pre-transposed / stacked for the kernels.  Weights bf16, biases f32.
# -----------------------------------------------------------------------------
def init_params(key, vocab, hidden):
    bound = 1.0 / jnp.sqrt(jnp.float32(hidden))
    ks = jax.random.split(key, 10)
    u = lambda k, shape: jax.random.uniform(k, shape, jnp.float32, -bound, bound)

    w_ih_l0 = u(ks[0], (4 * hidden, vocab))
    w_hh_l0 = u(ks[1], (4 * hidden, hidden))
    b_ih_l0 = u(ks[2], (4 * hidden,))
    b_hh_l0 = u(ks[3], (4 * hidden,))
    w_ih_l1 = u(ks[4], (4 * hidden, hidden))
    w_hh_l1 = u(ks[5], (4 * hidden, hidden))
    b_ih_l1 = u(ks[6], (4 * hidden,))
    b_hh_l1 = u(ks[7], (4 * hidden,))
    w_out = u(ks[8], (vocab, hidden))
    b_out = u(ks[9], (vocab,))

    bf16 = jnp.bfloat16
    return {
        "wih1_t": w_ih_l0.T.astype(bf16),                                 # (V, 4H)
        "b1": (b_ih_l0 + b_hh_l0).reshape(1, 4 * hidden),                 # f32
        "whh1_t": w_hh_l0.T.astype(bf16),                                 # (H, 4H)
        "w2_t": jnp.concatenate([w_ih_l1.T, w_hh_l1.T], 0).astype(bf16),  # (2H, 4H)
        "b2": (b_ih_l1 + b_hh_l1).reshape(1, 4 * hidden),                 # f32
        "wout_t": w_out.T.astype(bf16),                                   # (H, V)
        "bout": b_out.reshape(1, vocab),                                  # f32
    }


if __name__ == "__main__":
    # NOTE: per review, the recurrence is latency-bound at small batch; callers should batch
    # up to ~128 (v5e) / ~256 (v6e/v7x) sequences to fill the MXU rows.  Kept small here.
    batch, seq, vocab, hidden, layers = 8, 16, 128, 128, 2

    key = jax.random.PRNGKey(0)
    k_p, k_x = jax.random.split(key)
    params = init_params(k_p, vocab, hidden)

    x = jax.random.normal(k_x, (batch, seq, vocab), jnp.float32)
    h_0 = jnp.zeros((layers, batch, hidden), jnp.float32)
    c_0 = jnp.zeros((layers, batch, hidden), jnp.float32)

    logits, (h_n, c_n) = text_generation_forward(x, h_0, c_0, params)
    jax.block_until_ready((logits, h_n, c_n))

    ref_logits, (ref_h, ref_c) = ref_forward(x, h_0, c_0, params)
    assert logits.shape == (batch, seq, vocab)
    assert h_n.shape == (layers, batch, hidden) and c_n.shape == (layers, batch, hidden)
    assert jnp.allclose(logits, ref_logits, atol=1e-2, rtol=1e-2)
    assert jnp.allclose(h_n, ref_h, atol=1e-2, rtol=1e-2)
    assert jnp.allclose(c_n, ref_c, atol=1e-2, rtol=1e-2)

    print("KERNEL_OK")
</pallas_src>

<mosaic_0001>
module attributes {stable_mosaic.version = 11 : i64} {
  func.func @_input_proj_kernel(%arg0: i32, %arg1: i32, %arg2: memref<8x16x128xf32, #tpu.memory_space<vmem>>, %arg3: memref<128x512xbf16, #tpu.memory_space<vmem>>, %arg4: memref<1x512xf32, #tpu.memory_space<vmem>>, %arg5: memref<16x8x512xf32, #tpu.memory_space<vmem>>, %arg6: memref<128x512xf32, #tpu.memory_space<vmem>>) attributes {dimension_semantics = [#tpu.dimension_semantics<parallel>, #tpu.dimension_semantics<arbitrary>], iteration_bounds = array<i64: 1, 1>, scalar_prefetch = 0 : i64, scratch_operands = 1 : i64, tpu.core_type = #tpu.core_type<tc>, window_params = [{transform_indices = @transform_0, window_bounds = array<i64: 8, 16, 128>}, {transform_indices = @transform_1, window_bounds = array<i64: 128, 512>}, {pipeline_mode = #tpu.pipeline_mode<synchronous>, transform_indices = @transform_2, window_bounds = array<i64: 1, 512>}, {transform_indices = @transform_3, window_bounds = array<i64: 16, 8, 512>}]} {
    %c0_i32 = arith.constant 0 : i32
    %0 = arith.cmpi eq, %arg1, %c0_i32 : i32
    %1 = arith.extui %0 : i1 to i32
    %c0_i32_0 = arith.constant 0 : i32
    %2 = arith.cmpi ne, %1, %c0_i32_0 : i32
    scf.if %2 {
      %cst_11 = arith.constant 0.000000e+00 : f32
      %14 = vector.broadcast %cst_11 : f32 to vector<128x512xf32>
      %c0_12 = arith.constant 0 : index
      %c0_13 = arith.constant 0 : index
      %15 = vector.load %arg6[%c0_12, %c0_13] : memref<128x512xf32, #tpu.memory_space<vmem>>, vector<128x512xf32>
      tpu.vector_store %arg6[%c0_12, %c0_13], %14 {strides = array<i32>} : memref<128x512xf32, #tpu.memory_space<vmem>>, vector<128x512xf32>,
    } else {
    }
    %c0 = arith.constant 0 : index
    %c0_1 = arith.constant 0 : index
    %c0_2 = arith.constant 0 : index
    %3 = vector.load %arg2[%c0, %c0_1, %c0_2] : memref<8x16x128xf32, #tpu.memory_space<vmem>>, vector<8x16x128xf32>
    %4 = vector.shape_cast %3 : vector<8x16x128xf32> to vector<128x128xf32>
    %5 = arith.truncf %4 : vector<128x128xf32> to vector<128x128xbf16>
    %c0_3 = arith.constant 0 : index
    %c0_4 = arith.constant 0 : index
    %6 = vector.load %arg6[%c0_3, %c0_4] : memref<128x512xf32, #tpu.memory_space<vmem>>, vector<128x512xf32>
    %c0_5 = arith.constant 0 : index
    %c0_6 = arith.constant 0 : index
    %7 = vector.load %arg3[%c0_5, %c0_6] : memref<128x512xbf16, #tpu.memory_space<vmem>>, vector<128x512xbf16>
    %cst = arith.constant dense<0.000000e+00> : vector<128x512xf32>
    %8 = tpu.matmul %5, %7, %cst {dimension_numbers = #tpu.dot_dimension_numbers<[1], [0], [0], [1], [0, 0, 1, 1], [], []>} : vector<128x128xbf16>, vector<128x512xbf16>, vector<128x512xf32> -> vector<128x512xf32>
    %9 = arith.addf %6, %8 : vector<128x512xf32>
    %c0_7 = arith.constant 0 : index
    %c0_8 = arith.constant 0 : index
    %10 = vector.load %arg6[%c0_7, %c0_8] : memref<128x512xf32, #tpu.memory_space<vmem>>, vector<128x512xf32>
    tpu.vector_store %arg6[%c0_7, %c0_8], %9 {strides = array<i32>} : memref<128x512xf32, #tpu.memory_space<vmem>>, vector<128x512xf32>,
    %c0_i32_9 = arith.constant 0 : i32
    %11 = arith.cmpi eq, %arg1, %c0_i32_9 : i32
    %12 = arith.extui %11 : i1 to i32
    %c0_i32_10 = arith.constant 0 : i32
    %13 = arith.cmpi ne, %12, %c0_i32_10 : i32
    scf.if %13 {
      %c0_11 = arith.constant 0 : index
      %c0_12 = arith.constant 0 : index
      %14 = vector.load %arg6[%c0_11, %c0_12] : memref<128x512xf32, #tpu.memory_space<vmem>>, vector<128x512xf32>
      %c0_13 = arith.constant 0 : index
      %c0_14 = arith.constant 0 : index
      %15 = vector.load %arg4[%c0_13, %c0_14] : memref<1x512xf32, #tpu.memory_space<vmem>>, vector<1x512xf32>
      %16 = vector.broadcast %15 : vector<1x512xf32> to vector<128x512xf32>
      %17 = arith.addf %14, %16 : vector<128x512xf32>
      %18 = vector.shape_cast %17 : vector<128x512xf32> to vector<8x16x512xf32>
      %19 = tpu.transpose %18, [1, 0, 2] : vector<8x16x512xf32> -> vector<16x8x512xf32>
      %c0_15 = arith.constant 0 : index
      %c0_16 = arith.constant 0 : index
      %c0_17 = arith.constant 0 : index
      %20 = vector.load %arg5[%c0_15, %c0_16, %c0_17] : memref<16x8x512xf32, #tpu.memory_space<vmem>>, vector<16x8x512xf32>
      tpu.vector_store %arg5[%c0_15, %c0_16, %c0_17], %19 {strides = array<i32>} : memref<16x8x512xf32, #tpu.memory_space<vmem>>, vector<16x8x512xf32>,
    } else {
    }
    return
  }
  func.func @transform_0(%arg0: i32, %arg1: i32) -> (i32, i32, i32) {
    %c0_i32 = arith.constant 0 : i32
    %c0_i32_0 = arith.constant 0 : i32
    return %c0_i32, %arg0, %arg1 : i32, i32, i32
  }
  func.func @transform_1(%arg0: i32, %arg1: i32) -> (i32, i32) {
    %c0_i32 = arith.constant 0 : i32
    %c0_i32_0 = arith.constant 0 : i32
    return %arg1, %c0_i32 : i32, i32
  }
  func.func @transform_2(%arg0: i32, %arg1: i32) -> (i32, i32) {
    %c0_i32 = arith.constant 0 : i32
    %c0_i32_0 = arith.constant 0 : i32
    %c0_i32_1 = arith.constant 0 : i32
    return %c0_i32, %c0_i32_0 : i32, i32
  }
  func.func @transform_3(%arg0: i32, %arg1: i32) -> (i32, i32, i32) {
    %c0_i32 = arith.constant 0 : i32
    %c0_i32_0 = arith.constant 0 : i32
    %c0_i32_1 = arith.constant 0 : i32
    return %arg0, %c0_i32, %c0_i32_0 : i32, i32, i32
  }
}

</mosaic_0001>

<bundles_post_ra>
// kernel: tpu_custom_call.1
= control target key start
LH: loop header
LB: loop body
LE: loop exit
PB: predicated region body
PF: predicated region fallthrough
CT: control target
= control target key end

     0   :  { %8 = vsyncpa [#allocation4], 0  ;;  %s2953_s0 = inlined_call_operand.hbm [shape: f32[8,16,128], index: 0, kind: input, shape index: {}]   ;;  %s2954_s1 = inlined_call_operand.hbm [shape: bf16[128,512], index: 1, kind: input, shape index: {}]   ;;  %s2955_s2 = inlined_call_operand.hbm [shape: f32[1,512], index: 2, kind: input, shape index: {}]   ;;  %s2956_s3 = inlined_call_operand.hbm [shape: f32[16,8,512], index: 3, kind: output, shape index: {}]  }
   0x1   :  { %9 = vsyncpa [#allocation7], 0 }
   0x2   :  { %10 = vsyncpa [#allocation5], 0  ;;  %s2259_s12 = smov [#allocation6]  }
   0x3   :  { %s28_s13 = sshll.u32 %s2259_s12, 4  ;;  %s29_s13 = int_to_ptr.vmem [resolvable:$true] %s28_s13 }
   0x4   :  { %s2181_s14 = scalar_lea.vmem %s29_s13, 4096  ;;  %p2186_p1 = scmp.lt.s32.totalorder %s29_s13, %s29_s13 }
   0x5   :  { %p2182_p0 = scmp.ne.s32.totalorder %s29_s13, %s2181_s14  ;;  %p2187_p2 = scmp.lt.s32.totalorder %s2181_s14, %s2181_s14 }
   0x7   :  { %p2188_p3 = por %p2187_p2, %p2186_p1 }
   0x9   :  { %p2189_p4 = pnand %p2188_p3, %p2182_p0 }
   0xb   :  { %2192 = shalt.err (!%p2189_p4)
}
   0xc   :  { %s2260_s15 = smov 256   ;;  %s2261_s16 = smov 16  }
   0xd   :  { %34 = dma.hbm_to_vmem [thread:$0]  %s2954_s1, 4096, %s29_s13, [#allocation7], %s2260_s15, %s2260_s15, %s2261_s16  }
   0xe   :  { %s2262_s19 = smov [#allocation3]  }
   0xf   :  { %s16_s20 = sshll.u32 %s2262_s19, 4  ;;  %s17_s20 = int_to_ptr.vmem [resolvable:$true] %s16_s20 }
  0x10   :  { %s2201_s21 = scalar_lea.vmem %s17_s20, 2048  ;;  %p2206_p6 = scmp.lt.s32.totalorder %s17_s20, %s17_s20 }
  0x11   :  { %p2202_p5 = scmp.ne.s32.totalorder %s17_s20, %s2201_s21  ;;  %p2207_p7 = scmp.lt.s32.totalorder %s2201_s21, %s2201_s21 }
  0x13   :  { %p2208_p8 = por %p2207_p7, %p2206_p6 }
  0x15   :  { %p2209_p9 = pnand %p2208_p8, %p2202_p5 }
  0x17   :  { %2212 = shalt.err (!%p2209_p9)
}
  0x18   :  { %s2263_s22 = smov 128   ;;  %s2264_s23 = smov 8  }
  0x19   :  { %22 = dma.hbm_to_vmem [thread:$0]  %s2953_s0, 2048, %s17_s20, [#allocation4], %s2263_s22, %s2263_s22, %s2264_s23  }
  0x1a   :  { %s2265_s26 = smov [#allocation8]  }
  0x1b   :  { %s41_s27 = sshll.u32 %s2265_s26, 4  ;;  %s42_s27 = int_to_ptr.vmem [resolvable:$true] %s41_s27 }
  0x1c   :  { %s2221_s1 = scalar_lea.vmem %s42_s27, 64  ;;  %p2226_p11 = scmp.lt.s32.totalorder %s42_s27, %s42_s27 }
  0x1d   :  { %p2222_p10 = scmp.ne.s32.totalorder %s42_s27, %s2221_s1  ;;  %p2227_p12 = scmp.lt.s32.totalorder %s2221_s1, %s2221_s1 }
  0x1f   :  { %p2228_p13 = por %p2227_p12, %p2226_p11 }
  0x21   :  { %p2229_p0 = pnand %p2228_p13, %p2222_p10 }
  0x23   :  { %2232 = shalt.err (!%p2229_p0)
}
  0x24   :  { %44 = dma.hbm_to_vmem [thread:$0]  %s2955_s2, 64, %s42_s27, [#allocation7]  }
  0x25   :  { %2253 = dma.done.wait [#allocation4], 2048  }
  0x26   :  { %2254 = vsyncadd [#allocation4], 4294965248 }
  0x27   :  { %2255 = dma.done.wait [#allocation7], 4160  }
  0x28   :  { %2256 = vsyncadd [#allocation7], 4294963136  ;;  %v2266_v0 = vmov 0   ;;  %v2125_v1 = vld [vmem:[#allocation6 + $0xe4] ss:$16 sps:$4 sm:$0xff]   ;;  %v124_v34 = vld [vmem:[#allocation3 + $0x8] sm:$0xff]  ;;  %v826_v61 = vlaneseq }
  0x29   :  { %435 = vmatprep.mubr.bf16.mxu0 %v2266_v0  ;;  %548 = vmatprep.mubr.bf16.mxu1 %v2266_v0  ;;  %v2127_v2 = vld [vmem:[#allocation6 + $0xec] ss:$16 sps:$4 sm:$0xff]   ;;  %v2129_v3 = vld [vmem:[#allocation6 + $0xe0] ss:$16 sps:$4 sm:$0xff]   ;;  %v2130_v4 = vld [vmem:[#allocation6 + $0xe8] ss:$16 sps:$4 sm:$0xff]  }
  0x2a   :  { %403 = vmatprep.subr.bf16.mxu0 %v2125_v1  ;;  %516 = vmatprep.subr.bf16.mxu1 %v2127_v2  ;;  %v2131_v5 = vld [vmem:[#allocation6 + $0xc4] ss:$16 sps:$4 sm:$0xff]   ;;  %v2133_v6 = vld [vmem:[#allocation6 + $0xcc] ss:$16 sps:$4 sm:$0xff]   ;;  %v2135_v7 = vld [vmem:[#allocation6 + $0xc0] ss:$16 sps:$4 sm:$0xff]  }
  0x2b   :  { %404 = vmatpush1.bf16.msra.mxu0 %v2129_v3  ;;  %517 = vmatpush1.bf16.msra.mxu1 %v2130_v4  ;;  %v2136_v8 = vld [vmem:[#allocation6 + $0xc8] ss:$16 sps:$4 sm:$0xff]   ;;  %v2137_v9 = vld [vmem:[#allocation6 + $0xa4] ss:$16 sps:$4 sm:$0xff]   ;;  %v2139_v10 = vld [vmem:[#allocation6 + $0xac] ss:$16 sps:$4 sm:$0xff]  }
  0x2c   :  { %405 = vmatprep.subr.bf16.mxu0 %v2131_v5  ;;  %518 = vmatprep.subr.bf16.mxu1 %v2133_v6  ;;  %v2141_v11 = vld [vmem:[#allocation6 + $0xa0] ss:$16 sps:$4 sm:$0xff]   ;;  %v2142_v12 = vld [vmem:[#allocation6 + $0xa8] ss:$16 sps:$4 sm:$0xff]   ;;  %v2143_v13 = vld [vmem:[#allocation6 + $0x84] ss:$16 sps:$4 sm:$0xff]  }
  0x2d   :  { %v2145_v14 = vld [vmem:[#allocation6 + $0x8c] ss:$16 sps:$4 sm:$0xff]   ;;  %v2147_v15 = vld [vmem:[#allocation6 + $0x80] ss:$16 sps:$4 sm:$0xff]   ;;  %v2148_v16 = vld [vmem:[#allocation6 + $0x88] ss:$16 sps:$4 sm:$0xff]  }
  0x2e   :  { %v2149_v17 = vld [vmem:[#allocation6 + $0x64] ss:$16 sps:$4 sm:$0xff]   ;;  %v2151_v18 = vld [vmem:[#allocation6 + $0x6c] ss:$16 sps:$4 sm:$0xff]   ;;  %v2153_v19 = vld [vmem:[#allocation6 + $0x60] ss:$16 sps:$4 sm:$0xff]  }
  0x2f   :  { %406 = vmatpush1.bf16.msra.mxu0 %v2135_v7  ;;  %519 = vmatpush1.bf16.msra.mxu1 %v2136_v8  ;;  %v2154_v20 = vld [vmem:[#allocation6 + $0x68] ss:$16 sps:$4 sm:$0xff]   ;;  %v2155_v21 = vld [vmem:[#allocation6 + $0x44] ss:$16 sps:$4 sm:$0xff]   ;;  %v2157_v22 = vld [vmem:[#allocation6 + $0x4c] ss:$16 sps:$4 sm:$0xff]  }
  0x30   :  { %407 = vmatprep.subr.bf16.mxu0 %v2137_v9  ;;  %520 = vmatprep.subr.bf16.mxu1 %v2139_v10  ;;  %v2159_v23 = vld [vmem:[#allocation6 + $0x40] ss:$16 sps:$4 sm:$0xff]   ;;  %v2160_v24 = vld [vmem:[#allocation6 + $0x48] ss:$16 sps:$4 sm:$0xff]   ;;  %v2161_v25 = vld [vmem:[#allocation6 + $0x24] ss:$16 sps:$4 sm:$0xff]  }
  0x31   :  { %v2163_v26 = vld [vmem:[#allocation6 + $0x2c] ss:$16 sps:$4 sm:$0xff]   ;;  %v2165_v27 = vld [vmem:[#allocation6 + $0x20] ss:$16 sps:$4 sm:$0xff]   ;;  %v2166_v28 = vld [vmem:[#allocation6 + $0x28] ss:$16 sps:$4 sm:$0xff]  }
  0x32   :  { %v2167_v29 = vld [vmem:[#allocation6 + $0x4] ss:$16 sps:$4 sm:$0xff]   ;;  %v2169_v30 = vld [vmem:[#allocation6 + $0xc] ss:$16 sps:$4 sm:$0xff]   ;;  %v2171_v31 = vld [vmem:[#allocation6] ss:$16 sps:$4 sm:$0xff]  }
  0x33   :  { %408 = vmatpush1.bf16.msra.mxu0 %v2141_v11  ;;  %521 = vmatpush1.bf16.msra.mxu1 %v2142_v12  ;;  %v2172_v32 = vld [vmem:[#allocation6 + $0x8] ss:$16 sps:$4 sm:$0xff]   ;;  %v123_v33 = vld [vmem:[#allocation3] sm:$0xff]  ;;  %v125_v36 = vld [vmem:[#allocation3 + $0x10] sm:$0xff]  ;;  %v827_v3 = vshrl.u32 %v826_v61, 7  ;;  %s2269_s0 = smov [#allocation9]  }
  0x34   :  { %409 = vmatprep.subr.bf16.mxu0 %v2143_v13  ;;  %522 = vmatprep.subr.bf16.mxu1 %v2145_v14  ;;  %v139_v35 = vpack.c.bf16 %v124_v34, %v123_v33  ;;  %v126_v37 = vld [vmem:[#allocation3 + $0x18] sm:$0xff]  ;;  %v127_v39 = vld [vmem:[#allocation3 + $0x20] sm:$0xff]  ;;  %v128_v40 = vld [vmem:[#allocation3 + $0x28] sm:$0xff]  ;;  %v2268_v11 = vmov 1934713408   ;;  %s2067_s2 = sshll.u32 %s2269_s0, 4  ;;  %s2943_s2 = int_to_ptr.vmem [resolvable:$true] %s2067_s2 }
  0x35   :  { %v140_v38 = vpack.c.bf16 %v126_v37, %v125_v36  ;;  %v141_v41 = vpack.c.bf16 %v128_v40, %v127_v39  ;;  %v129_v42 = vld [vmem:[#allocation3 + $0x30] sm:$0xff]  ;;  %v130_v43 = vld [vmem:[#allocation3 + $0x38] sm:$0xff]  ;;  %v131_v45 = vld [vmem:[#allocation3 + $0x40] sm:$0xff]  ;;  %v828_v9 = vsub.s32 0, %v827_v3  ;;  %v836_v10 = vsub.s32 2, %v827_v3  ;;  %s2233_s30 = scalar_lea.vmem %s2943_s2, 8192  ;;  %p2238_p2 = scmp.lt.s32.totalorder %s2943_s2, %s2943_s2 }
  0x36   :  { %v142_v44 = vpack.c.bf16 %v130_v43, %v129_v42  ;;  %v132_v46 = vld [vmem:[#allocation3 + $0x48] sm:$0xff]  ;;  %v133_v48 = vld [vmem:[#allocation3 + $0x50] sm:$0xff]  ;;  %v134_v49 = vld [vmem:[#allocation3 + $0x58] sm:$0xff]  ;;  %v977_v12 = vunpack.c.l.s4 %v2268_v11  ;;  %v832_v14 = vsub.s32 1, %v827_v3  ;;  %p2234_p1 = scmp.ne.s32.totalorder %s2943_s2, %s2233_s30  ;;  %p2239_p3 = scmp.lt.s32.totalorder %s2233_s30, %s2233_s30 }
  0x37   :  { %410 = vmatpush1.bf16.msra.mxu0 %v2147_v15  ;;  %523 = vmatpush1.bf16.msra.mxu1 %v2148_v16  ;;  %v143_v47 = vpack.c.bf16 %v132_v46, %v131_v45  ;;  %v144_v50 = vpack.c.bf16 %v134_v49, %v133_v48  ;;  %v135_v51 = vld [vmem:[#allocation3 + $0x60] sm:$0xff]  ;;  %v136_v52 = vld [vmem:[#allocation3 + $0x68] sm:$0xff]  ;;  %v137_v54 = vld [vmem:[#allocation3 + $0x70] sm:$0xff]  ;;  %v840_v15 = vsub.s32 3, %v827_v3 }
  0x38   :  { %411 = vmatprep.subr.bf16.mxu0 %v2149_v17  ;;  %524 = vmatprep.subr.bf16.mxu1 %v2151_v18  ;;  %v145_v53 = vpack.c.bf16 %v136_v52, %v135_v51  ;;  %v138_v55 = vld [vmem:[#allocation3 + $0x78] sm:$0xff]  ;;  %v824_v13 = vld [vmem:[#allocation8] sm:$0xf]  ;;  %p2240_p4 = por %p2239_p3, %p2238_p2 }
  0x39   :  { %v146_v56 = vpack.c.bf16 %v138_v55, %v137_v54 }
  0x3a   :  { %p2241_p5 = pnand %p2240_p4, %p2234_p1 }
  0x3b   :  { %412 = vmatpush1.bf16.msra.mxu0 %v2153_v19  ;;  %525 = vmatpush1.bf16.msra.mxu1 %v2154_v20 }
  0x3c   :  { %413 = vmatprep.subr.bf16.mxu0 %v2155_v21  ;;  %526 = vmatprep.subr.bf16.mxu1 %v2157_v22  ;;  %v2317_v21 = vrot.slane %v824_v13, %v828_v9  ;;  %v2319_v22 = vrot.slane %v824_v13, %v836_v10 }
  0x3f   :  { %414 = vmatpush1.bf16.msra.mxu0 %v2159_v23  ;;  %527 = vmatpush1.bf16.msra.mxu1 %v2160_v24  ;;  %v978_v23 = vunpack.c.0.s8 %v977_v12  ;;  %v2321_v24 = vrot.slane %v824_v13, %v832_v14 }
  0x40   :  { %415 = vmatprep.subr.bf16.mxu0 %v2161_v25  ;;  %528 = vmatprep.subr.bf16.mxu1 %v2163_v26  ;;  %v2323_v25 = vrot.slane %v824_v13, %v840_v15 }
  0x43   :  { %416 = vmatpush1.bf16.msra.mxu0 %v2165_v27  ;;  %529 = vmatpush1.bf16.msra.mxu1 %v2166_v28 }
  0x44   :  { %417 = vmatprep.subr.bf16.mxu0 %v2167_v29  ;;  %530 = vmatprep.subr.bf16.mxu1 %v2169_v30 }
  0x47   :  { %418 = vmatpush1.bf16.msra.mxu0 %v2171_v31  ;;  %531 = vmatpush1.bf16.msra.mxu1 %v2172_v32 }
  0x4a   :  { %436 = vmatmul.mubr.bf16.vlgmr.msra.gmra.mxu0 %v139_v35  ;;  %549 = vmatmul.mubr.bf16.vlgmr.msra.gmra.mxu1 %v139_v35  ;;  %v2331_v35 = vsub.s32 %v978_v23, %v827_v3 }
  0x4b   :  { %445 = vmatprep.mubr.bf16.mxu0 %v2266_v0  ;;  %558 = vmatprep.mubr.bf16.mxu1 %v2266_v0 }
  0x52   :  { %446 = vmatmul.mubr.bf16.gmra.mxu0 %v140_v38  ;;  %559 = vmatmul.mubr.bf16.gmra.mxu1 %v140_v38 }
  0x53   :  { %455 = vmatprep.mubr.bf16.mxu0 %v2266_v0  ;;  %568 = vmatprep.mubr.bf16.mxu1 %v2266_v0 }
  0x5a   :  { %456 = vmatmul.mubr.bf16.gmra.mxu0 %v141_v41  ;;  %569 = vmatmul.mubr.bf16.gmra.mxu1 %v141_v41 }
  0x5b   :  { %465 = vmatprep.mubr.bf16.mxu0 %v2266_v0  ;;  %578 = vmatprep.mubr.bf16.mxu1 %v2266_v0 }
  0x62   :  { %466 = vmatmul.mubr.bf16.gmra.mxu0 %v142_v44  ;;  %579 = vmatmul.mubr.bf16.gmra.mxu1 %v142_v44 }
  0x63   :  { %475 = vmatprep.mubr.bf16.mxu0 %v2266_v0  ;;  %588 = vmatprep.mubr.bf16.mxu1 %v2266_v0 }
  0x6a   :  { %476 = vmatmul.mubr.bf16.gmra.mxu0 %v143_v47  ;;  %589 = vmatmul.mubr.bf16.gmra.mxu1 %v143_v47 }
  0x6b   :  { %485 = vmatprep.mubr.bf16.mxu0 %v2266_v0  ;;  %598 = vmatprep.mubr.bf16.mxu1 %v2266_v0 }
  0x72   :  { %486 = vmatmul.mubr.bf16.gmra.mxu0 %v144_v50  ;;  %599 = vmatmul.mubr.bf16.gmra.mxu1 %v144_v50 }
  0x73   :  { %495 = vmatprep.mubr.bf16.mxu0 %v2266_v0  ;;  %608 = vmatprep.mubr.bf16.mxu1 %v2266_v0 }
  0x7a   :  { %496 = vmatmul.mubr.bf16.gmra.mxu0 %v145_v53  ;;  %609 = vmatmul.mubr.bf16.gmra.mxu1 %v145_v53 }
  0x7b   :  { %505 = vmatprep.mubr.bf16.mxu0 %v2266_v0  ;;  %618 = vmatprep.mubr.bf16.mxu1 %v2266_v0  ;;  %v2267_v0 = vmov 1983009808  }
  0x7c   :  { %v913_v8 = vunpack.c.l.s4 %v2267_v0 }
  0x7e   :  { %v914_v20 = vunpack.c.0.s8 %v913_v8 }
  0x80   :  { %v2326_v29 = vsub.s32 %v914_v20, %v827_v3 }
  0x82   :  { %506 = vmatmul.mubr.bf16.gmra.mxu0 %v146_v56  ;;  %619 = vmatmul.mubr.bf16.gmra.mxu1 %v146_v56 }
 0x10a   :  { %v437_v57 = vpop.f32.mrf.mxu0  ;;  %v550_v58 = vpop.f32.mrf.mxu1 }
 0x10b   :  { %v846_v32 = vadd.f32 %v2317_v21, %v437_v57  ;;  %v848_v33 = vadd.f32 %v2319_v22, %v550_v58 }
 0x10c   :  { %v439_v59 = vpop.f32.mrf.mxu0  ;;  %v552_v60 = vpop.f32.mrf.mxu1 }
 0x10d   :  { %v847_v36 = vadd.f32 %v2321_v24, %v439_v59  ;;  %v849_v37 = vadd.f32 %v2323_v25, %v552_v60 }
 0x10e   :  { %v441_v62 = vpop.f32.mrf.mxu0  ;;  %v554_v63 = vpop.f32.mrf.mxu1 }
 0x10f   :  { %v2336_v38 = vadd.f32 %v2317_v21, %v441_v62  ;;  %v2339_v39 = vadd.f32 %v2319_v22, %v554_v63 }
 0x110   :  { %v443_v1 = vpop.f32.mrf.mxu0  ;;  %v556_v2 = vpop.f32.mrf.mxu1 }
 0x111   :  { %v2342_v42 = vadd.f32 %v2321_v24, %v443_v1  ;;  %v2345_v43 = vadd.f32 %v2323_v25, %v556_v2 }
 0x112   :  { %v447_v4 = vpop.f32.mrf.mxu0  ;;  %v560_v5 = vpop.f32.mrf.mxu1 }
 0x113   :  { %v854_v44 = vadd.f32 %v2317_v21, %v447_v4  ;;  %v2350_v46 = vadd.f32 %v2319_v22, %v560_v5 }
 0x114   :  { %v449_v6 = vpop.f32.mrf.mxu0  ;;  %v562_v7 = vpop.f32.mrf.mxu1 }
 0x115   :  { %v2353_v47 = vadd.f32 %v2321_v24, %v449_v6  ;;  %v2356_v48 = vadd.f32 %v2323_v25, %v562_v7 }
 0x116   :  { %v451_v16 = vpop.f32.mrf.mxu0  ;;  %v564_v17 = vpop.f32.mrf.mxu1 }
 0x117   :  { %v2365_v56 = vadd.f32 %v2317_v21, %v451_v16  ;;  %v2368_v57 = vadd.f32 %v2319_v22, %v564_v17 }
 0x118   :  { %v453_v18 = vpop.f32.mrf.mxu0  ;;  %v566_v19 = vpop.f32.mrf.mxu1 }
 0x119   :  { %v2372_v62 = vadd.f32 %v2321_v24, %v453_v18  ;;  %v2385_v8 = vadd.f32 %v2323_v25, %v566_v19 }
 0x11a   :  { %v457_v26 = vpop.f32.mrf.mxu0  ;;  %v570_v27 = vpop.f32.mrf.mxu1 }
 0x11b   :  { %v862_v28 = vadd.f32 %v2317_v21, %v457_v26  ;;  %v864_v34 = vadd.f32 %v2319_v22, %v570_v27 }
 0x11c   :  { %v459_v30 = vpop.f32.mrf.mxu0  ;;  %v572_v31 = vpop.f32.mrf.mxu1 }
 0x11d   :  { %v863_v45 = vadd.f32 %v2321_v24, %v459_v30  ;;  %v910_v49 = vcombine.low %v846_v32, %v862_v28  ;;  %v911_v52 = vcombine.high %v846_v32, %v862_v28  ;;  %v1454_v53 = vcombine.low %v848_v33, %v864_v34 }
 0x11e   :  { %v461_v40 = vpop.f32.mrf.mxu0  ;;  %v574_v41 = vpop.f32.mrf.mxu1  ;;  %v1455_v58 = vcombine.high %v848_v33, %v864_v34  ;;  %v865_v59 = vadd.f32 %v2323_v25, %v572_v31 }
 0x11f   :  { %v1182_v63 = vcombine.low %v847_v36, %v863_v45  ;;  %v866_v1 = vadd.f32 %v2317_v21, %v461_v40  ;;  %v868_v2 = vadd.f32 %v2319_v22, %v574_v41  ;;  %v2388_v9 = vrot.slane %v910_v49, %v2326_v29 }
 0x120   :  { %v463_v50 = vpop.f32.mrf.mxu0  ;;  %v576_v51 = vpop.f32.mrf.mxu1  ;;  %v2391_v10 = vrot.slane %v911_v52, %v2326_v29  ;;  %v2394_v11 = vrot.slane %v1454_v53, %v2326_v29  ;;  %v2397_v12 = vrot.slane %v1455_v58, %v2326_v29  ;;  %v1183_v13 = vcombine.high %v847_v36, %v863_v45 }
 0x121   :  { %v2359_v54 = vadd.f32 %v2321_v24, %v463_v50  ;;  %v2362_v55 = vadd.f32 %v2323_v25, %v576_v51  ;;  %v1726_v14 = vcombine.low %v849_v37, %v865_v59  ;;  %v1727_v15 = vcombine.high %v849_v37, %v865_v59 }
 0x122   :  { %v467_v60 = vpop.f32.mrf.mxu0  ;;  %v580_v61 = vpop.f32.mrf.mxu1  ;;  %v1046_v18 = vcombine.low %v2336_v38, %v866_v1  ;;  %v2404_v26 = vrot.slane %v1182_v63, %v2326_v29  ;;  %v1047_v27 = vcombine.high %v2336_v38, %v866_v1  ;;  %v1590_v28 = vcombine.low %v2339_v39, %v868_v2 }
 0x123   :  { %v1318_v3 = vcombine.low %v2342_v42, %v2359_v54  ;;  %v1319_v4 = vcombine.high %v2342_v42, %v2359_v54  ;;  %v1862_v5 = vcombine.low %v2345_v43, %v2362_v55  ;;  %v1863_v6 = vcombine.high %v2345_v43, %v2362_v55 }
 0x124   :  { %v469_v7 = vpop.f32.mrf.mxu0  ;;  %v582_v0 = vpop.f32.mrf.mxu1  ;;  %v870_v19 = vadd.f32 %v2317_v21, %v467_v60  ;;  %v872_v20 = vadd.f32 %v2319_v22, %v580_v61  ;;  %v1591_v33 = vcombine.high %v2339_v39, %v868_v2  ;;  %v2416_v40 = vrot.slane %v1183_v13, %v2326_v29 }
 0x125   :  { %v871_v23 = vadd.f32 %v2321_v24, %v469_v7  ;;  %v873_v30 = vadd.f32 %v2323_v25, %v582_v0  ;;  %v2419_v41 = vrot.slane %v1726_v14, %v2326_v29  ;;  %v2422_v38 = vrot.slane %v1727_v15, %v2326_v29 }
 0x126   :  { %v471_v16 = vpop.f32.mrf.mxu0  ;;  %v584_v17 = vpop.f32.mrf.mxu1  ;;  %v926_v34 = vcombine.low %v854_v44, %v870_v19  ;;  %v927_v36 = vcombine.high %v854_v44, %v870_v19  ;;  %v1470_v37 = vcombine.low %v2350_v46, %v872_v20  ;;  %v1471_v42 = vcombine.high %v2350_v46, %v872_v20 }
 0x127   :  { %v2430_v39 = vrot.slane %v1046_v18, %v2326_v29  ;;  %v1198_v50 = vcombine.low %v2353_v47, %v871_v23  ;;  %v2436_v51 = vrot.slane %v1047_v27, %v2326_v29  ;;  %v2439_v52 = vrot.slane %v1590_v28, %v2326_v29 }
 0x128   :  { %v2409_v31 = vpop.f32.mrf.mxu0  ;;  %v2411_v32 = vpop.f32.mrf.mxu1  ;;  %v934_v44 = vrot.slane %v926_v34, %v2326_v29  ;;  %v941_v49 = vrot.slane %v927_v36, %v2326_v29  ;;  %v1199_v46 = vcombine.high %v2353_v47, %v871_v23  ;;  %v1742_v53 = vcombine.low %v2356_v48, %v873_v30 }
 0x129   :  { %v2448_v58 = vrot.slane %v1591_v33, %v2326_v29  ;;  %v2451_v59 = vrot.slane %v1318_v3, %v2326_v29  ;;  %v2454_v60 = vrot.slane %v1470_v37, %v2326_v29  ;;  %v1743_v61 = vcombine.high %v2356_v48, %v873_v30 }
 0x12a   :  { %v2425_v43 = vpop.f32.mrf.mxu0  ;;  %v2427_v45 = vpop.f32.mrf.mxu1  ;;  %v2458_v63 = vrot.slane %v1319_v4, %v2326_v29  ;;  %v974_v47 = vcombine.low %v2388_v9, %v934_v44  ;;  %v975_v1 = vcombine.high %v2388_v9, %v934_v44  ;;  %v2463_v2 = vrot.slane %v1471_v42, %v2326_v29 }
 0x12b   :  { %v2470_v3 = vrot.slane %v1862_v5, %v2326_v29  ;;  %v990_v13 = vcombine.low %v2391_v10, %v941_v49  ;;  %v991_v48 = vcombine.high %v2391_v10, %v941_v49  ;;  %v2475_v4 = vrot.slane %v1198_v50, %v2326_v29 }
 0x12c   :  { %v2443_v54 = vpop.f32.mrf.mxu0  ;;  %v2445_v55 = vpop.f32.mrf.mxu1  ;;  %2980 = vst [vmem:[#allocation13_spill] sm:$0xff] %v2458_v63  ;;  %v2478_v14 = vrot.slane %v1863_v6, %v2326_v29  ;;  %v2481_v9 = vrot.slane %v1199_v46, %v2326_v29  ;;  %v2484_v15 = vrot.slane %v1742_v53, %v2326_v29  ;;  %v874_v18 = vadd.f32 %v2317_v21, %v471_v16 }
 0x12d   :  { %2981 = vst [vmem:[#allocation14_spill] sm:$0xff] %v2470_v3  ;;  %v1518_v10 = vcombine.low %v2394_v11, %v2454_v60  ;;  %v1519_v20 = vcombine.high %v2394_v11, %v2454_v60  ;;  %v2496_v6 = vrot.slane %v1743_v61, %v2326_v29  ;;  %v876_v23 = vadd.f32 %v2319_v22, %v584_v17 }
 0x12e   :  { %v2465_v7 = vpop.f32.mrf.mxu0  ;;  %v2467_v0 = vpop.f32.mrf.mxu1  ;;  %2982 = vst [vmem:[#allocation15_spill] sm:$0xff] %v2478_v14  ;;  %v2500_v27 = vrot.slane %v974_v47, %v2331_v35  ;;  %v2503_v16 = vrot.slane %v975_v1, %v2331_v35  ;;  %v1534_v28 = vcombine.low %v2397_v12, %v2463_v2  ;;  %v1535_v30 = vcombine.high %v2397_v12, %v2463_v2 }
 0x12f   :  { %v2514_v34 = vrot.slane %v990_v13, %v2331_v35  ;;  %v2517_v17 = vrot.slane %v991_v48, %v2331_v35  ;;  %v1246_v36 = vcombine.low %v2404_v26, %v2475_v4  ;;  %v1247_v37 = vcombine.high %v2404_v26, %v2475_v4 }
 0x130   :  { %v2487_v5 = vpop.f32.mrf.mxu0  ;;  %v2489_v19 = vpop.f32.mrf.mxu1  ;;  %v1262_v42 = vcombine.low %v2416_v40, %v2481_v9  ;;  %v1263_v12 = vcombine.high %v2416_v40, %v2481_v9  ;;  %v1790_v44 = vcombine.low %v2419_v41, %v2484_v15  ;;  %v1791_v49 = vcombine.high %v2419_v41, %v2484_v15 }
 0x131   :  { %v1062_v53 = vcombine.low %v2365_v56, %v874_v18  ;;  %v1063_v26 = vcombine.high %v2365_v56, %v874_v18  ;;  %v1606_v60 = vcombine.low %v2368_v57, %v876_v23  ;;  %v1607_v61 = vcombine.high %v2368_v57, %v876_v23 }
 0x132   :  { %v2509_v33 = vpop.f32.mrf.mxu0  ;;  %v2511_v11 = vpop.f32.mrf.mxu1  ;;  %v1806_v40 = vcombine.low %v2422_v38, %v2496_v6  ;;  %v1807_v47 = vcombine.high %v2422_v38, %v2496_v6  ;;  %v875_v41 = vadd.f32 %v2321_v24, %v2409_v31  ;;  %v877_v1 = vadd.f32 %v2323_v25, %v2411_v32 }
 0x133   :  { %v1070_v56 = vrot.slane %v1062_v53, %v2326_v29  ;;  %v1077_v57 = vrot.slane %v1063_v26, %v2326_v29  ;;  %v1614_v48 = vrot.slane %v1606_v60, %v2326_v29  ;;  %v1621_v4 = vrot.slane %v1607_v61, %v2326_v29 }
 0x134   :  { %v2531_v50 = vpop.f32.mrf.mxu0  ;;  %v2533_v46 = vpop.f32.mrf.mxu1  ;;  %v1334_v38 = vcombine.low %v2372_v62, %v875_v41  ;;  %v1335_v9 = vcombine.high %v2372_v62, %v875_v41  ;;  %v1878_v31 = vcombine.low %v2385_v8, %v877_v1  ;;  %v1879_v32 = vcombine.high %v2385_v8, %v877_v1 }
 0x135   :  { %v1110_v6 = vcombine.low %v2430_v39, %v1070_v56  ;;  %v1111_v23 = vcombine.high %v2430_v39, %v1070_v56  ;;  %v1126_v53 = vcombine.low %v2436_v51, %v1077_v57  ;;  %v1127_v26 = vcombine.high %v2436_v51, %v1077_v57 }
 0x136   :  { %v2547_v2 = vpop.f32.mrf.mxu0  ;;  %v2549_v13 = vpop.f32.mrf.mxu1  ;;  %v1654_v60 = vcombine.low %v2439_v52, %v1614_v48  ;;  %v1655_v62 = vcombine.high %v2439_v52, %v1614_v48  ;;  %v1670_v61 = vcombine.low %v2448_v58, %v1621_v4  ;;  %v1671_v8 = vcombine.high %v2448_v58, %v1621_v4 }
 0x137   :  { %v2578_v39 = vrot.slane %v1534_v28, %v2331_v35  ;;  %v2581_v51 = vrot.slane %v1535_v30, %v2331_v35  ;;  %v2584_v52 = vrot.slane %v1246_v36, %v2331_v35  ;;  %v2587_v56 = vrot.slane %v1247_v37, %v2331_v35 }
 0x138   :  { %v2559_v15 = vpop.f32.mrf.mxu0  ;;  %v2561_v18 = vpop.f32.mrf.mxu1  ;;  %v2590_v58 = vrot.slane %v1262_v42, %v2331_v35  ;;  %v1342_v28 = vrot.slane %v1334_v38, %v2326_v29  ;;  %v2597_v48 = vrot.slane %v1335_v9, %v2326_v29  ;;  %v2600_v30 = vrot.slane %v1878_v31, %v2326_v29 }
 0x139   :  { %2983 = vst [vmem:[#allocation16_spill] sm:$0xff] %v2559_v15  ;;  %2984 = vst [vmem:[#allocation17_spill] sm:$0xff] %v2561_v18  ;;  %v2572_v18 = vrot.slane %v1518_v10, %v2331_v35  ;;  %v2575_v15 = vrot.slane %v1519_v20, %v2331_v35  ;;  %v2593_v10 = vrot.slane %v1263_v12, %v2331_v35 }
 0x13a   :  { %v497_v41 = vpop.f32.mrf.mxu0  ;;  %v610_v1 = vpop.f32.mrf.mxu1  ;;  %2985 = vst [vmem:[#allocation18_spill] sm:$0xff] %v2597_v48  ;;  %2986 = vst [vmem:[#allocation19_spill] sm:$0xff] %v2600_v30  ;;  %v2603_v36 = vrot.slane %v1879_v32, %v2326_v29  ;;  %v2606_v37 = vrot.slane %v1790_v44, %v2331_v35  ;;  %v2609_v42 = vrot.slane %v1791_v49, %v2331_v35 }
 0x13b   :  { %v2612_v12 = vrot.slane %v1806_v40, %v2331_v35  ;;  %v2615_v4 = vrot.slane %v1807_v47, %v2331_v35  ;;  %v1382_v38 = vcombine.low %v2451_v59, %v1342_v28  ;;  %v1383_v9 = vcombine.high %v2451_v59, %v1342_v28 }
 0x13c   :  { %v499_v20 = vpop.f32.mrf.mxu0  ;;  %v612_v57 = vpop.f32.mrf.mxu1  ;;  %2987 = vst [vmem:[#allocation20_spill] sm:$0xff] %v2603_v36  ;;  %2988 = vst [vmem:[#allocation21_spill] sm:$0xff] %v2606_v37  ;;  %v2632_v28 = vrot.slane %v1110_v6, %v2331_v35  ;;  %v2635_v31 = vrot.slane %v1111_v23, %v2331_v35  ;;  %v878_v44 = vadd.f32 %v2317_v21, %v2425_v43 }
 0x13d   :  { %v880_v49 = vadd.f32 %v2319_v22, %v2427_v45  ;;  %v2642_v40 = vrot.slane %v1126_v53, %v2331_v35  ;;  %v2645_v47 = vrot.slane %v1127_v26, %v2331_v35  ;;  %v2648_v59 = vrot.slane %v1654_v60, %v2331_v35 }
 0x13e   :  { %v501_v32 = vpop.f32.mrf.mxu0  ;;  %v614_v37 = vpop.f32.mrf.mxu1  ;;  %v2651_v6 = vrot.slane %v1655_v62, %v2331_v35  ;;  %v2654_v23 = vrot.slane %v1670_v61, %v2331_v35  ;;  %v2657_v43 = vrot.slane %v1671_v8, %v2331_v35  ;;  %v879_v45 = vadd.f32 %v2321_v24, %v2443_v54 }
 0x13f   :  { %v881_v53 = vadd.f32 %v2323_v25, %v2445_v55  ;;  %v2664_v60 = vrot.slane %v1382_v38, %v2331_v35  ;;  %v2667_v62 = vrot.slane %v1383_v9, %v2331_v35  ;;  %v882_v61 = vadd.f32 %v2317_v21, %v2465_v7 }
 0x140   :  { %2989 = vst [vmem:[#allocation22_spill] sm:$0xff] %v2651_v6  ;;  %2990 = vst [vmem:[#allocation23_spill] sm:$0xff] %v2654_v23  ;;  %v503_v26 = vpop.f32.mrf.mxu0  ;;  %v616_v36 = vpop.f32.mrf.mxu1  ;;  %v884_v8 = vadd.f32 %v2319_v22, %v2467_v0  ;;  %v2675_v54 = vadd.f32 %v2321_v24, %v2487_v5  ;;  %v2679_v55 = vadd.f32 %v2323_v25, %v2489_v19 }
 0x141   :  { %2991 = vst [vmem:[#allocation24_spill] sm:$0xff] %v2657_v43  ;;  %2992 = vst [vmem:[#allocation25_spill] sm:$0xff] %v2664_v60  ;;  %v894_v38 = vadd.f32 %v2317_v21, %v497_v41  ;;  %v896_v60 = vadd.f32 %v2319_v22, %v610_v1  ;;  %v886_v9 = vadd.f32 %v2317_v21, %v2509_v33 }
 0x142   :  { %2993 = vst [vmem:[#allocation26_spill] sm:$0xff] %v2667_v62  ;;  %2994 = vst [vmem:[#allocation27_spill] sm:$0xff] %v2675_v54  ;;  %v895_v7 = vadd.f32 %v2321_v24, %v499_v20  ;;  %v897_v62 = vadd.f32 %v2323_v25, %v612_v57  ;;  %v898_v0 = vadd.f32 %v2317_v21, %v501_v32  ;;  %v507_v19 = vpop.f32.mrf.mxu0 }
 0x143   :  { %2995 = vst [vmem:[#allocation28_spill] sm:$0xff] %v2679_v55  ;;  %v942_v14 = vcombine.low %v878_v44, %v894_v38  ;;  %v943_v5 = vcombine.high %v878_v44, %v894_v38  ;;  %v1486_v30 = vcombine.low %v880_v49, %v896_v60  ;;  %v900_v3 = vadd.f32 %v2319_v22, %v614_v37  ;;  %v620_v55 = vpop.f32.mrf.mxu1 }
 0x144   :  { %v888_v41 = vadd.f32 %v2319_v22, %v2511_v11  ;;  %v2693_v1 = vadd.f32 %v2321_v24, %v2531_v50  ;;  %v2697_v33 = vadd.f32 %v2323_v25, %v2533_v46  ;;  %v2701_v20 = vadd.f32 %v2317_v21, %v2547_v2  ;;  %v509_v2 = vpop.f32.mrf.mxu0 }
 0x145   :  { %v1487_v57 = vcombine.high %v880_v49, %v896_v60  ;;  %v1214_v44 = vcombine.low %v879_v45, %v895_v7  ;;  %v1215_v37 = vcombine.high %v879_v45, %v895_v7  ;;  %v1758_v32 = vcombine.low %v881_v53, %v897_v62  ;;  %v622_v6 = vpop.f32.mrf.mxu1 }
 0x146   :  { %v2705_v38 = vadd.f32 %v2319_v22, %v2549_v13  ;;  %v950_v11 = vrot.slane %v942_v14, %v2326_v29  ;;  %v957_v50 = vrot.slane %v943_v5, %v2326_v29  ;;  %v1759_v48 = vcombine.high %v881_v53, %v897_v62 }
 0x147   :  { %v1494_v46 = vrot.slane %v1486_v30, %v2326_v29  ;;  %v1078_v63 = vcombine.low %v882_v61, %v898_v0  ;;  %v1079_v43 = vcombine.high %v882_v61, %v898_v0  ;;  %v1622_v23 = vcombine.low %v884_v8, %v900_v3 }
 0x148   :  { %v1623_v49 = vcombine.high %v884_v8, %v900_v3  ;;  %v2711_v45 = vadd.f32 %v2321_v24, %v503_v26  ;;  %v902_v60 = vadd.f32 %v2317_v21, %v507_v19  ;;  %v904_v13 = vadd.f32 %v2319_v22, %v620_v55  ;;  %v511_v19 = vpop.f32.mrf.mxu0 }
 0x149   :  { %v1501_v14 = vrot.slane %v1487_v57, %v2326_v29  ;;  %v2717_v7 = vrot.slane %v1214_v44, %v2326_v29  ;;  %v2720_v30 = vrot.slane %v1215_v37, %v2326_v29  ;;  %v2723_v53 = vrot.slane %v1758_v32, %v2326_v29  ;;  %v624_v57 = vpop.f32.mrf.mxu1 }
 0x14a   :  { %2996 = vst [vmem:[#allocation29_spill] sm:$0xff] %v2711_v45  ;;  %v2726_v3 = vrot.slane %v1759_v48, %v2326_v29  ;;  %v2729_v26 = vrot.slane %v1078_v63, %v2326_v29  ;;  %v2732_v62 = vrot.slane %v1079_v43, %v2326_v29  ;;  %v2735_v61 = vadd.f32 %v2323_v25, %v616_v36 }
 0x14b   :  { %v958_v8 = vcombine.low %v886_v9, %v902_v60  ;;  %v959_v55 = vcombine.high %v886_v9, %v902_v60  ;;  %v1502_v0 = vcombine.low %v888_v41, %v904_v13  ;;  %v1503_v5 = vcombine.high %v888_v41, %v904_v13 }
 0x14c   :  { %v2738_v44 = vrot.slane %v1622_v23, %v2326_v29  ;;  %v2741_v48 = vrot.slane %v1623_v49, %v2326_v29  ;;  %v903_v23 = vadd.f32 %v2321_v24, %v509_v2  ;;  %v2753_v32 = vadd.f32 %v2323_v25, %v622_v6 }
 0x14d   :  { %v966_v36 = vrot.slane %v958_v8, %v2326_v29  ;;  %v973_v9 = vrot.slane %v959_v55, %v2326_v29  ;;  %v1510_v41 = vrot.slane %v1502_v0, %v2326_v29  ;;  %v1517_v37 = vrot.slane %v1503_v5, %v2326_v29 }
 0x14e   :  { %v2756_v49 = vadd.f32 %v2317_v21, %v511_v19  ;;  %v2759_v60 = vadd.f32 %v2319_v22, %v624_v57 }
 0x14f   :  { %v1006_v13 = vcombine.low %v950_v11, %v966_v36  ;;  %v1007_v43 = vcombine.high %v950_v11, %v966_v36  ;;  %v1022_v8 = vcombine.low %v957_v50, %v973_v9  ;;  %v1023_v63 = vcombine.high %v957_v50, %v973_v9 }
 0x150   :  { %v1550_v55 = vcombine.low %v1494_v46, %v1510_v41  ;;  %v1551_v45 = vcombine.high %v1494_v46, %v1510_v41  ;;  %v1566_v0 = vcombine.low %v1501_v14, %v1517_v37  ;;  %v1567_v54 = vcombine.high %v1501_v14, %v1517_v37 }
 0x151   :  { %v1014_v5 = vrot.slane %v1006_v13, %v2331_v35  ;;  %v1021_v2 = vrot.slane %v1007_v43, %v2331_v35  ;;  %v1030_v6 = vrot.slane %v1022_v8, %v2331_v35  ;;  %v1037_v21 = vrot.slane %v1023_v63, %v2331_v35 }
 0x152   :  { %v1558_v19 = vrot.slane %v1550_v55, %v2331_v35  ;;  %v1565_v22 = vrot.slane %v1551_v45, %v2331_v35  ;;  %v1574_v11 = vrot.slane %v1566_v0, %v2331_v35  ;;  %v1581_v50 = vrot.slane %v1567_v54, %v2331_v35 }
 0x153   :  { %v1038_v46 = vcombine.low %v2500_v27, %v1014_v5  ;;  %v1039_v14 = vcombine.high %v2500_v27, %v1014_v5  ;;  %v1040_v57 = vcombine.low %v2503_v16, %v1021_v2  ;;  %v1041_v43 = vcombine.high %v2503_v16, %v1021_v2 }
 0x154   :  { %v1042_v36 = vcombine.low %v2514_v34, %v1030_v6  ;;  %v1043_v63 = vcombine.high %v2514_v34, %v1030_v6  ;;  %v1044_v9 = vcombine.low %v2517_v17, %v1037_v21  ;;  %v1045_v45 = vcombine.high %v2517_v17, %v1037_v21 }
 0x155   :  { %1998 = vst [vmem:[#allocation9] sm:$0xff] %v1038_v46  ;;  %2002 = vst [vmem:[#allocation9 + $0x20] sm:$0xff] %v1039_v14  ;;  %v1582_v54 = vcombine.low %v2572_v18, %v1558_v19  ;;  %v1583_v27 = vcombine.high %v2572_v18, %v1558_v19  ;;  %v1584_v41 = vcombine.low %v2575_v15, %v1565_v22 }
 0x156   :  { %2006 = vst [vmem:[#allocation9 + $0x40] sm:$0xff] %v1040_v57  ;;  %2010 = vst [vmem:[#allocation9 + $0x60] sm:$0xff] %v1041_v43  ;;  %v1585_v16 = vcombine.high %v2575_v15, %v1565_v22  ;;  %v1586_v34 = vcombine.low %v2578_v39, %v1574_v11  ;;  %v1587_v17 = vcombine.high %v2578_v39, %v1574_v11 }
 0x157   :  { %2014 = vst [vmem:[#allocation9 + $0x80] sm:$0xff] %v1042_v36  ;;  %2018 = vst [vmem:[#allocation9 + $0xa0] sm:$0xff] %v1043_v63  ;;  %v1588_v37 = vcombine.low %v2581_v51, %v1581_v50  ;;  %v1589_v13 = vcombine.high %v2581_v51, %v1581_v50  ;;  %v1230_v18 = vcombine.low %v2693_v1, %v903_v23 }
 0x158   :  { %2022 = vst [vmem:[#allocation9 + $0xc0] sm:$0xff] %v1044_v9  ;;  %2026 = vst [vmem:[#allocation9 + $0xe0] sm:$0xff] %v1045_v45  ;;  %v1231_v15 = vcombine.high %v2693_v1, %v903_v23  ;;  %v1774_v8 = vcombine.low %v2697_v33, %v2753_v32  ;;  %v1775_v55 = vcombine.high %v2697_v33, %v2753_v32 }
 0x159   :  { %2000 = vst [vmem:[#allocation9 + $0x10] sm:$0xff] %v1582_v54  ;;  %2004 = vst [vmem:[#allocation9 + $0x30] sm:$0xff] %v1583_v27  ;;  %v1094_v39 = vcombine.low %v2701_v20, %v2756_v49  ;;  %v1095_v51 = vcombine.high %v2701_v20, %v2756_v49  ;;  %v1638_v0 = vcombine.low %v2705_v38, %v2759_v60 }
 0x15a   :  { %2008 = vst [vmem:[#allocation9 + $0x50] sm:$0xff] %v1584_v41  ;;  %2012 = vst [vmem:[#allocation9 + $0x70] sm:$0xff] %v1585_v16  ;;  %v1639_v1 = vcombine.high %v2705_v38, %v2759_v60  ;;  %v1238_v23 = vrot.slane %v1230_v18, %v2326_v29  ;;  %v1245_v33 = vrot.slane %v1231_v15, %v2326_v29 }
 0x15b   :  { %2016 = vst [vmem:[#allocation9 + $0x90] sm:$0xff] %v1586_v34  ;;  %2020 = vst [vmem:[#allocation9 + $0xb0] sm:$0xff] %v1587_v17  ;;  %v1782_v32 = vrot.slane %v1774_v8, %v2326_v29  ;;  %v1789_v5 = vrot.slane %v1775_v55, %v2326_v29  ;;  %v1102_v2 = vrot.slane %v1094_v39, %v2326_v29  ;;  %v2997_v17 = vld [vmem:[#allocation21_spill] sm:$0xff] }
 0x15c   :  { %2024 = vst [vmem:[#allocation9 + $0xd0] sm:$0xff] %v1588_v37  ;;  %2028 = vst [vmem:[#allocation9 + $0xf0] sm:$0xff] %v1589_v13  ;;  %v2805_v6 = vrot.slane %v1095_v51, %v2326_v29  ;;  %v2808_v20 = vrot.slane %v1638_v0, %v2326_v29  ;;  %v2811_v49 = vrot.slane %v1639_v1, %v2326_v29 }
 0x15d   :  { %v1278_v38 = vcombine.low %v2717_v7, %v1238_v23  ;;  %v1279_v60 = vcombine.high %v2717_v7, %v1238_v23  ;;  %v1294_v21 = vcombine.low %v2720_v30, %v1245_v33  ;;  %v1295_v19 = vcombine.high %v2720_v30, %v1245_v33 }
 0x15e   :  { %v1822_v22 = vcombine.low %v2723_v53, %v1782_v32  ;;  %v1823_v11 = vcombine.high %v2723_v53, %v1782_v32  ;;  %v1838_v50 = vcombine.low %v2726_v3, %v1789_v5  ;;  %v1839_v46 = vcombine.high %v2726_v3, %v1789_v5 }
 0x15f   :  { %v1286_v14 = vrot.slane %v1278_v38, %v2331_v35  ;;  %v1293_v57 = vrot.slane %v1279_v60, %v2331_v35  ;;  %v1302_v43 = vrot.slane %v1294_v21, %v2331_v35  ;;  %v1309_v7 = vrot.slane %v1295_v19, %v2331_v35  ;;  %v513_v19 = vpop.f32.mrf.mxu0 }
 0x160   :  { %v1830_v36 = vrot.slane %v1822_v22, %v2331_v35  ;;  %v1837_v30 = vrot.slane %v1823_v11, %v2331_v35  ;;  %v1846_v63 = vrot.slane %v1838_v50, %v2331_v35  ;;  %v1853_v53 = vrot.slane %v1839_v46, %v2331_v35  ;;  %v626_v22 = vpop.f32.mrf.mxu1  ;;  %v2998_v50 = vld [vmem:[#allocation22_spill] sm:$0xff] }
 0x161   :  { %v1310_v9 = vcombine.low %v2584_v52, %v1286_v14  ;;  %v1311_v3 = vcombine.high %v2584_v52, %v1286_v14  ;;  %v1312_v45 = vcombine.low %v2587_v56, %v1293_v57  ;;  %v1313_v54 = vcombine.high %v2587_v56, %v1293_v57  ;;  %v3000_v57 = vld [vmem:[#allocation24_spill] sm:$0xff] }
 0x162   :  { %v1314_v27 = vcombine.low %v2590_v58, %v1302_v43  ;;  %v1315_v41 = vcombine.high %v2590_v58, %v1302_v43  ;;  %v1316_v16 = vcombine.low %v2593_v10, %v1309_v7  ;;  %v1317_v34 = vcombine.high %v2593_v10, %v1309_v7 }
 0x163   :  { %1999 = vst [vmem:[#allocation9 + $0x8] sm:$0xff] %v1310_v9  ;;  %2003 = vst [vmem:[#allocation9 + $0x28] sm:$0xff] %v1311_v3  ;;  %v1854_v37 = vcombine.low %v2997_v17, %v1830_v36  ;;  %v1855_v52 = vcombine.high %v2997_v17, %v1830_v36  ;;  %v1856_v13 = vcombine.low %v2609_v42, %v1837_v30  ;;  %v3001_v36 = vld [vmem:[#allocation16_spill] sm:$0xff]  ;;  %v3003_v3 = vld [vmem:[#allocation13_spill] sm:$0xff] }
 0x164   :  { %2007 = vst [vmem:[#allocation9 + $0x48] sm:$0xff] %v1312_v45  ;;  %2011 = vst [vmem:[#allocation9 + $0x68] sm:$0xff] %v1313_v54  ;;  %v1857_v56 = vcombine.high %v2609_v42, %v1837_v30  ;;  %v1858_v58 = vcombine.low %v2612_v12, %v1846_v63  ;;  %v1859_v10 = vcombine.high %v2612_v12, %v1846_v63  ;;  %v3004_v45 = vld [vmem:[#allocation18_spill] sm:$0xff] }
 0x165   :  { %2015 = vst [vmem:[#allocation9 + $0x88] sm:$0xff] %v1314_v27  ;;  %2019 = vst [vmem:[#allocation9 + $0xa8] sm:$0xff] %v1315_v41  ;;  %v1860_v18 = vcombine.low %v2615_v4, %v1853_v53  ;;  %v1861_v15 = vcombine.high %v2615_v4, %v1853_v53  ;;  %v1142_v8 = vcombine.low %v2729_v26, %v1102_v2 }
 0x166   :  { %2023 = vst [vmem:[#allocation9 + $0xc8] sm:$0xff] %v1316_v16  ;;  %2027 = vst [vmem:[#allocation9 + $0xe8] sm:$0xff] %v1317_v34  ;;  %v1143_v42 = vcombine.high %v2729_v26, %v1102_v2  ;;  %v1158_v55 = vcombine.low %v2732_v62, %v2805_v6  ;;  %v1159_v39 = vcombine.high %v2732_v62, %v2805_v6  ;;  %v3007_v34 = vld [vmem:[#allocation28_spill] sm:$0xff] }
 0x167   :  { %2001 = vst [vmem:[#allocation9 + $0x18] sm:$0xff] %v1854_v37  ;;  %2005 = vst [vmem:[#allocation9 + $0x38] sm:$0xff] %v1855_v52  ;;  %v1686_v12 = vcombine.low %v2738_v44, %v2808_v20  ;;  %v1687_v4 = vcombine.high %v2738_v44, %v2808_v20  ;;  %v1702_v51 = vcombine.low %v2741_v48, %v2811_v49 }
 0x168   :  { %2009 = vst [vmem:[#allocation9 + $0x58] sm:$0xff] %v1856_v13  ;;  %2013 = vst [vmem:[#allocation9 + $0x78] sm:$0xff] %v1857_v56  ;;  %v1703_v26 = vcombine.high %v2741_v48, %v2811_v49  ;;  %v1150_v0 = vrot.slane %v1142_v8, %v2331_v35  ;;  %v1157_v62 = vrot.slane %v1143_v42, %v2331_v35  ;;  %v3008_v56 = vld [vmem:[#allocation14_spill] sm:$0xff]  ;;  %v3013_v42 = vld [vmem:[#allocation29_spill] sm:$0xff] }
 0x169   :  { %2017 = vst [vmem:[#allocation9 + $0x98] sm:$0xff] %v1858_v58  ;;  %2021 = vst [vmem:[#allocation9 + $0xb8] sm:$0xff] %v1859_v10  ;;  %v1166_v1 = vrot.slane %v1158_v55, %v2331_v35  ;;  %v1173_v23 = vrot.slane %v1159_v39, %v2331_v35  ;;  %v1694_v33 = vrot.slane %v1686_v12, %v2331_v35  ;;  %v3009_v58 = vld [vmem:[#allocation19_spill] sm:$0xff] }
 0x16a   :  { %2025 = vst [vmem:[#allocation9 + $0xd8] sm:$0xff] %v1860_v18  ;;  %2029 = vst [vmem:[#allocation9 + $0xf8] sm:$0xff] %v1861_v15  ;;  %v1701_v32 = vrot.slane %v1687_v4, %v2331_v35  ;;  %v1710_v44 = vrot.slane %v1702_v51, %v2331_v35  ;;  %v1717_v5 = vrot.slane %v1703_v26, %v2331_v35 }
 0x16b   :  { %v1174_v2 = vcombine.low %v2632_v28, %v1150_v0  ;;  %v1175_v48 = vcombine.high %v2632_v28, %v1150_v0  ;;  %v1176_v6 = vcombine.low %v2635_v31, %v1157_v62  ;;  %v1177_v20 = vcombine.high %v2635_v31, %v1157_v62 }
 0x16c   :  { %v1178_v49 = vcombine.low %v2642_v40, %v1166_v1  ;;  %v1179_v38 = vcombine.high %v2642_v40, %v1166_v1  ;;  %v1180_v60 = vcombine.low %v2645_v47, %v1173_v23  ;;  %v1181_v21 = vcombine.high %v2645_v47, %v1173_v23  ;;  %v2999_v40 = vld [vmem:[#allocation23_spill] sm:$0xff]  ;;  %v3017_v23 = vld [vmem:[#allocation20_spill] sm:$0xff] }
 0x16d   :  { %2030 = vst [vmem:[#allocation9 + $0x100] sm:$0xff] %v1174_v2  ;;  %2034 = vst [vmem:[#allocation9 + $0x120] sm:$0xff] %v1175_v48  ;;  %v1718_v28 = vcombine.low %v2648_v59, %v1694_v33  ;;  %v1719_v11 = vcombine.high %v2648_v59, %v1694_v33  ;;  %v1720_v31 = vcombine.low %v2998_v50, %v1701_v32  ;;  %v3002_v59 = vld [vmem:[#allocation17_spill] sm:$0xff]  ;;  %v3016_v1 = vld [vmem:[#allocation15_spill] sm:$0xff] }
 0x16e   :  { %2038 = vst [vmem:[#allocation9 + $0x140] sm:$0xff] %v1176_v6  ;;  %2042 = vst [vmem:[#allocation9 + $0x160] sm:$0xff] %v1177_v20  ;;  %v1721_v46 = vcombine.high %v2998_v50, %v1701_v32  ;;  %v1722_v47 = vcombine.low %v2999_v40, %v1710_v44  ;;  %v1723_v14 = vcombine.high %v2999_v40, %v1710_v44 }
 0x16f   :  { %2046 = vst [vmem:[#allocation9 + $0x180] sm:$0xff] %v1178_v49  ;;  %2050 = vst [vmem:[#allocation9 + $0x1a0] sm:$0xff] %v1179_v38  ;;  %v1724_v43 = vcombine.low %v3000_v57, %v1717_v5  ;;  %v1725_v7 = vcombine.high %v3000_v57, %v1717_v5  ;;  %v891_v30 = vadd.f32 %v2321_v24, %v3001_v36 }
 0x170   :  { %2054 = vst [vmem:[#allocation9 + $0x1c0] sm:$0xff] %v1180_v60  ;;  %2058 = vst [vmem:[#allocation9 + $0x1e0] sm:$0xff] %v1181_v21  ;;  %v893_v63 = vadd.f32 %v2323_v25, %v3002_v59  ;;  %v907_v53 = vadd.f32 %v2321_v24, %v513_v19  ;;  %v909_v9 = vadd.f32 %v2323_v25, %v626_v22 }
 0x171   :  { %2032 = vst [vmem:[#allocation9 + $0x110] sm:$0xff] %v1718_v28  ;;  %2036 = vst [vmem:[#allocation9 + $0x130] sm:$0xff] %v1719_v11  ;;  %v3005_v54 = vcombine.low %v3003_v3, %v3004_v45  ;;  %v3006_v41 = vcombine.high %v3003_v3, %v3004_v45  ;;  %v1894_v17 = vcombine.low %v3007_v34, %v2735_v61 }
 0x172   :  { %2040 = vst [vmem:[#allocation9 + $0x150] sm:$0xff] %v1720_v31  ;;  %2044 = vst [vmem:[#allocation9 + $0x170] sm:$0xff] %v1721_v46  ;;  %v1895_v37 = vcombine.high %v3007_v34, %v2735_v61  ;;  %v1366_v24 = vcombine.low %v891_v30, %v907_v53  ;;  %v1367_v25 = vcombine.high %v891_v30, %v907_v53  ;;  %v3012_v61 = vld [vmem:[#allocation27_spill] sm:$0xff] }
 0x173   :  { %v1406_v27 = vrot.slane %v3005_v54, %v2331_v35  ;;  %v1413_v16 = vrot.slane %v3006_v41, %v2331_v35  ;;  %2048 = vst [vmem:[#allocation9 + $0x190] sm:$0xff] %v1722_v47  ;;  %2052 = vst [vmem:[#allocation9 + $0x1b0] sm:$0xff] %v1723_v14  ;;  %v1910_v52 = vcombine.low %v893_v63, %v909_v9  ;;  %v3020_v14 = vld [vmem:[#allocation25_spill] sm:$0xff] }
 0x174   :  { %2056 = vst [vmem:[#allocation9 + $0x1d0] sm:$0xff] %v1724_v43  ;;  %2060 = vst [vmem:[#allocation9 + $0x1f0] sm:$0xff] %v1725_v7  ;;  %v1911_v13 = vcombine.high %v893_v63, %v909_v9  ;;  %v3010_v10 = vcombine.low %v3008_v56, %v3009_v58  ;;  %v3011_v15 = vcombine.high %v3008_v56, %v3009_v58  ;;  %v3021_v7 = vld [vmem:[#allocation26_spill] sm:$0xff] }
 0x175   :  { %v3014_v55 = vcombine.low %v3012_v61, %v3013_v42  ;;  %v3015_v12 = vcombine.high %v3012_v61, %v3013_v42  ;;  %v1374_v51 = vrot.slane %v1366_v24, %v2326_v29  ;;  %v1381_v26 = vrot.slane %v1367_v25, %v2326_v29 }
 0x176   :  { %v1934_v18 = vrot.slane %v3010_v10, %v2331_v35  ;;  %v1941_v8 = vrot.slane %v3011_v15, %v2331_v35  ;;  %v1918_v0 = vrot.slane %v1910_v52, %v2326_v29  ;;  %v1925_v62 = vrot.slane %v1911_v13, %v2326_v29 }
 0x177   :  { %v1358_v39 = vrot.slane %v3014_v55, %v2326_v29  ;;  %v1365_v4 = vrot.slane %v3015_v12, %v2326_v29  ;;  %v3018_v33 = vcombine.low %v3016_v1, %v3017_v23  ;;  %v3019_v44 = vcombine.high %v3016_v1, %v3017_v23 }
 0x178   :  { %v1902_v2 = vrot.slane %v1894_v17, %v2326_v29  ;;  %v1909_v48 = vrot.slane %v1895_v37, %v2326_v29 }
 0x179   :  { %v1950_v32 = vrot.slane %v3018_v33, %v2331_v35  ;;  %v1957_v5 = vrot.slane %v3019_v44, %v2331_v35  ;;  %v1414_v6 = vcombine.low %v1358_v39, %v1374_v51  ;;  %v1415_v20 = vcombine.high %v1358_v39, %v1374_v51 }
 0x17a   :  { %v1430_v49 = vcombine.low %v1365_v4, %v1381_v26  ;;  %v1431_v38 = vcombine.high %v1365_v4, %v1381_v26  ;;  %v1958_v60 = vcombine.low %v1902_v2, %v1918_v0  ;;  %v1959_v21 = vcombine.high %v1902_v2, %v1918_v0 }
 0x17b   :  { %v1974_v19 = vcombine.low %v1909_v48, %v1925_v62  ;;  %v1975_v22 = vcombine.high %v1909_v48, %v1925_v62  ;;  %v1422_v28 = vrot.slane %v1414_v6, %v2331_v35  ;;  %v1429_v11 = vrot.slane %v1415_v20, %v2331_v35 }
 0x17c   :  { %v1438_v50 = vrot.slane %v1430_v49, %v2331_v35  ;;  %v1445_v31 = vrot.slane %v1431_v38, %v2331_v35  ;;  %v1966_v46 = vrot.slane %v1958_v60, %v2331_v35  ;;  %v1973_v29 = vrot.slane %v1959_v21, %v2331_v35 }
 0x17d   :  { %v1982_v40 = vrot.slane %v1974_v19, %v2331_v35  ;;  %v1989_v47 = vrot.slane %v1975_v22, %v2331_v35  ;;  %v1446_v57 = vcombine.low %v3020_v14, %v1422_v28  ;;  %v1447_v43 = vcombine.high %v3020_v14, %v1422_v28 }
 0x17e   :  { %v1448_v36 = vcombine.low %v3021_v7, %v1429_v11  ;;  %v1449_v30 = vcombine.high %v3021_v7, %v1429_v11  ;;  %v1450_v59 = vcombine.low %v1406_v27, %v1438_v50  ;;  %v1451_v63 = vcombine.high %v1406_v27, %v1438_v50 }
 0x17f   :  { %v1452_v53 = vcombine.low %v1413_v16, %v1445_v31  ;;  %v1453_v9 = vcombine.high %v1413_v16, %v1445_v31  ;;  %2031 = vst [vmem:[#allocation9 + $0x108] sm:$0xff] %v1446_v57  ;;  %2035 = vst [vmem:[#allocation9 + $0x128] sm:$0xff] %v1447_v43  ;;  %v1990_v3 = vcombine.low %v1934_v18, %v1966_v46 }
 0x180   :  { %2039 = vst [vmem:[#allocation9 + $0x148] sm:$0xff] %v1448_v36  ;;  %2043 = vst [vmem:[#allocation9 + $0x168] sm:$0xff] %v1449_v30  ;;  %v1991_v35 = vcombine.high %v1934_v18, %v1966_v46  ;;  %v1992_v45 = vcombine.low %v1941_v8, %v1973_v29  ;;  %v1993_v54 = vcombine.high %v1941_v8, %v1973_v29 }
 0x181   :  { %2047 = vst [vmem:[#allocation9 + $0x188] sm:$0xff] %v1450_v59  ;;  %2051 = vst [vmem:[#allocation9 + $0x1a8] sm:$0xff] %v1451_v63  ;;  %v1994_v27 = vcombine.low %v1950_v32, %v1982_v40  ;;  %v1995_v41 = vcombine.high %v1950_v32, %v1982_v40  ;;  %v1996_v16 = vcombine.low %v1957_v5, %v1989_v47 }
 0x182   :  { %2055 = vst [vmem:[#allocation9 + $0x1c8] sm:$0xff] %v1452_v53  ;;  %2059 = vst [vmem:[#allocation9 + $0x1e8] sm:$0xff] %v1453_v9  ;;  %v1997_v34 = vcombine.high %v1957_v5, %v1989_v47 }
 0x183   :  { %2033 = vst [vmem:[#allocation9 + $0x118] sm:$0xff] %v1990_v3  ;;  %2037 = vst [vmem:[#allocation9 + $0x138] sm:$0xff] %v1991_v35 }
 0x184   :  { %2041 = vst [vmem:[#allocation9 + $0x158] sm:$0xff] %v1992_v45  ;;  %2045 = vst [vmem:[#allocation9 + $0x178] sm:$0xff] %v1993_v54 }
 0x185   :  { %2049 = vst [vmem:[#allocation9 + $0x198] sm:$0xff] %v1994_v27  ;;  %2053 = vst [vmem:[#allocation9 + $0x1b8] sm:$0xff] %v1995_v41 }
 0x186   :  { %2057 = vst [vmem:[#allocation9 + $0x1d8] sm:$0xff] %v1996_v16  ;;  %2061 = vst [vmem:[#allocation9 + $0x1f8] sm:$0xff] %v1997_v34 }
 0x187   :  { %2244 = shalt.err (!%p2241_p5)
}
 0x188   :  { %s2270_s4 = smov 512   ;;  %s2271_s5 = smov 32  }
 0x189   :  { %2073 = dma.vmem_to_hbm [thread:$0]  %s2943_s2, 8192, %s2956_s3, [#allocation5], %s2270_s4, %s2270_s4, %s2271_s5  }
 0x18a   :  { %2257 = dma.done.wait [#allocation5], 8192  }
 0x18b   :  { %2258 = vsyncadd [#allocation5], 4294959104 }
 0x18c   :  { %2077 = vsyncpa [#allocation4], 1 }
 0x18d   :  { %2078 = vsyncpa [#allocation7], 1 }
 0x18e   :  { %2079 = vsyncpa [#allocation5], 1 }

</bundles_post_ra>
